<compile_context>
chip_gen: v6e
topology: v6e:2x2x1
jax: 0.10.0
libtpu: 0.0.40
codegen_flags: <defaults>
</compile_context>

<pallas_src>
import functools
import math

import jax
import jax.numpy as jnp
from jax.experimental import pallas as pl
from jax.experimental.pallas import tpu as pltpu


_TWO_PI = 2.0 * math.pi
_INV_2_24 = 1.0 / 16777216.0  # 2**-24


def _gaussian_noise_kernel(x_ref, bits_ref, o_ref, *, stddev):
    """Blocks are (2, BR, L). Halves [0] and [1] share one Box-Muller pair."""
    # Top 24 bits of each 32-bit draw -> int32 in [0, 2^24).
    b1 = (bits_ref[0] >> 8) & 0xFFFFFF
    b2 = (bits_ref[1] >> 8) & 0xFFFFFF

    inv24 = jnp.float32(_INV_2_24)
    u1 = (b1.astype(jnp.float32) + jnp.float32(0.5)) * inv24   # (0, 1): never 0 -> log OK
    u2 = b2.astype(jnp.float32) * inv24                        # [0, 1)

    r = jnp.sqrt(jnp.float32(-2.0) * jnp.log(u1))
    theta = jnp.float32(_TWO_PI) * u2
    s = jnp.float32(stddev)

    x0 = x_ref[0].astype(jnp.float32)
    x1 = x_ref[1].astype(jnp.float32)
    # Use BOTH Box-Muller outputs: cos branch fills half 0, sin branch fills half 1.
    o_ref[0] = (x0 + s * (r * jnp.cos(theta))).astype(o_ref.dtype)
    o_ref[1] = (x1 + s * (r * jnp.sin(theta))).astype(o_ref.dtype)


def _choose_lanes(total):
    """Widest lane count (multiple of 128) such that 2*lanes divides `total`."""
    for lanes in (1024, 512, 256, 128):
        if total % (2 * lanes) == 0:
            return lanes, 0
    lanes = 128
    padded = pl.cdiv(total, 2 * lanes) * (2 * lanes)
    return lanes, padded - total


def gaussian_noise(x, stddev, seed, training=True, target_block_bytes=1 << 20):
    """Pallas equivalent of GaussianNoise.forward."""
    if not training:
        # Eval mode: identity, exactly like the PyTorch module.
        return x

    orig_shape = x.shape
    orig_dtype = x.dtype
    total = x.size

    lanes, pad = _choose_lanes(total)
    xf = x.reshape(-1)
    if pad:  # rare: only when total is not a multiple of 256
        xf = jnp.pad(xf, (0, pad))
    rows = (total + pad) // (2 * lanes)
    x3 = xf.reshape(2, rows, lanes)

    # One uint32 of entropy per output element (a Box-Muller pair consumes two
    # uniforms and emits two normals).  Stateless counter PRNG -> grid steps and
    # TensorCores are fully independent.
    key = jax.random.PRNGKey(seed)
    bits = jax.random.bits(key, (2, rows, lanes), dtype=jnp.uint32)
    bits = jax.lax.bitcast_convert_type(bits, jnp.int32)

    # ~target_block_bytes of f32 per output block; rows kept a multiple of 16 so the
    # bf16 (16, 128) tile constraint is satisfied when blocks tile the slab.
    target_rows = max(16, (target_block_bytes // (2 * lanes * 4) // 16) * 16)
    block_rows = rows if rows <= target_rows else target_rows
    grid = (pl.cdiv(rows, block_rows),)

    spec = pl.BlockSpec((2, block_rows, lanes), lambda i: (0, i, 0))
    out3 = pl.pallas_call(
        functools.partial(_gaussian_noise_kernel, stddev=float(stddev)),
        out_shape=jax.ShapeDtypeStruct((2, rows, lanes), orig_dtype),
        grid=grid,
        in_specs=[spec, spec],
        out_specs=spec,
        compiler_params=pltpu.CompilerParams(
            dimension_semantics=("parallel",),
        ),
    )(x3, bits)

    out = out3.reshape(-1)
    if pad:
        out = out[:total]
    return out.reshape(orig_shape)


if __name__ == "__main__":
    key = jax.random.PRNGKey(0)
    x = jax.random.normal(key, (2, 4, 16, 16), dtype=jnp.float32)
    stddev = 0.1

    # Training mode: x + noise
    y_train = jax.block_until_ready(gaussian_noise(x, stddev, seed=1234, training=True))
    # Eval mode: identity
    y_eval = jax.block_until_ready(gaussian_noise(x, stddev, seed=1234, training=False))

    assert y_train.shape == x.shape and y_train.dtype == x.dtype
    assert bool(jnp.all(y_eval == x))
    assert bool(jnp.all(jnp.isfinite(y_train)))

    noise = (y_train - x).astype(jnp.float32)
    n_mean = float(jnp.mean(noise))
    n_std = float(jnp.std(noise))
    # Loose statistical sanity checks on the injected noise (N = 2048 samples).
    assert abs(n_mean) < 0.02, n_mean            # ~9 sigma
    assert 0.07 < n_std < 0.13, n_std            # +/- 30% of stddev

    # bf16 input: dtype handled inside the kernel (no wrapper-side casts).
    xb = jax.random.normal(jax.random.PRNGKey(1), (4, 8, 32, 32), dtype=jnp.bfloat16)
    yb = jax.block_until_ready(gaussian_noise(xb, stddev, seed=7, training=True))
    assert yb.shape == xb.shape and yb.dtype == jnp.bfloat16
    assert bool(jnp.all(jnp.isfinite(yb.astype(jnp.float32))))

    print("KERNEL_OK")
</pallas_src>

<mosaic_0001>
module attributes {stable_mosaic.version = 11 : i64} {
  func.func @_gaussian_noise_kernel(%arg0: i32, %arg1: memref<2x1x1024xf32, #tpu.memory_space<vmem>>, %arg2: memref<2x1x1024xi32, #tpu.memory_space<vmem>>, %arg3: memref<2x1x1024xf32, #tpu.memory_space<vmem>>) attributes {dimension_semantics = [#tpu.dimension_semantics<parallel>], iteration_bounds = array<i64: 1>, scalar_prefetch = 0 : i64, scratch_operands = 0 : i64, tpu.core_type = #tpu.core_type<tc>, window_params = [{transform_indices = @transform_0, window_bounds = array<i64: 2, 1, 1024>}, {transform_indices = @transform_1, window_bounds = array<i64: 2, 1, 1024>}, {transform_indices = @transform_2, window_bounds = array<i64: 2, 1, 1024>}]} {
    %c0 = arith.constant 0 : index
    %c0_0 = arith.constant 0 : index
    %c0_1 = arith.constant 0 : index
    %0 = vector.load %arg2[%c0, %c0_0, %c0_1] : memref<2x1x1024xi32, #tpu.memory_space<vmem>>, vector<1x1x1024xi32>
    %1 = vector.shape_cast %0 : vector<1x1x1024xi32> to vector<1x1024xi32>
    %c8_i32 = arith.constant 8 : i32
    %2 = vector.broadcast %c8_i32 : i32 to vector<1x1024xi32>
    %3 = arith.shrsi %1, %2 : vector<1x1024xi32>
    %c16777215_i32 = arith.constant 16777215 : i32
    %4 = vector.broadcast %c16777215_i32 : i32 to vector<1x1024xi32>
    %5 = arith.andi %3, %4 : vector<1x1024xi32>
    %c1 = arith.constant 1 : index
    %c0_2 = arith.constant 0 : index
    %c0_3 = arith.constant 0 : index
    %6 = vector.load %arg2[%c1, %c0_2, %c0_3] : memref<2x1x1024xi32, #tpu.memory_space<vmem>>, vector<1x1x1024xi32>
    %7 = vector.shape_cast %6 : vector<1x1x1024xi32> to vector<1x1024xi32>
    %c8_i32_4 = arith.constant 8 : i32
    %8 = vector.broadcast %c8_i32_4 : i32 to vector<1x1024xi32>
    %9 = arith.shrsi %7, %8 : vector<1x1024xi32>
    %c16777215_i32_5 = arith.constant 16777215 : i32
    %10 = vector.broadcast %c16777215_i32_5 : i32 to vector<1x1024xi32>
    %11 = arith.andi %9, %10 : vector<1x1024xi32>
    %12 = arith.sitofp %5 : vector<1x1024xi32> to vector<1x1024xf32>
    %cst = arith.constant 5.000000e-01 : f32
    %13 = vector.broadcast %cst : f32 to vector<1x1024xf32>
    %14 = arith.addf %12, %13 : vector<1x1024xf32>
    %cst_6 = arith.constant 5.96046448E-8 : f32
    %15 = vector.broadcast %cst_6 : f32 to vector<1x1024xf32>
    %16 = arith.mulf %14, %15 : vector<1x1024xf32>
    %17 = arith.sitofp %11 : vector<1x1024xi32> to vector<1x1024xf32>
    %cst_7 = arith.constant 5.96046448E-8 : f32
    %18 = vector.broadcast %cst_7 : f32 to vector<1x1024xf32>
    %19 = arith.mulf %17, %18 : vector<1x1024xf32>
    %20 = math.log %16 : vector<1x1024xf32>
    %cst_8 = arith.constant -2.000000e+00 : f32
    %21 = vector.broadcast %cst_8 : f32 to vector<1x1024xf32>
    %22 = arith.mulf %21, %20 : vector<1x1024xf32>
    %23 = math.sqrt %22 : vector<1x1024xf32>
    %cst_9 = arith.constant 6.28318548 : f32
    %24 = vector.broadcast %cst_9 : f32 to vector<1x1024xf32>
    %25 = arith.mulf %24, %19 : vector<1x1024xf32>
    %c0_10 = arith.constant 0 : index
    %c0_11 = arith.constant 0 : index
    %c0_12 = arith.constant 0 : index
    %26 = vector.load %arg1[%c0_10, %c0_11, %c0_12] : memref<2x1x1024xf32, #tpu.memory_space<vmem>>, vector<1x1x1024xf32>
    %27 = vector.shape_cast %26 : vector<1x1x1024xf32> to vector<1x1024xf32>
    %c1_13 = arith.constant 1 : index
    %c0_14 = arith.constant 0 : index
    %c0_15 = arith.constant 0 : index
    %28 = vector.load %arg1[%c1_13, %c0_14, %c0_15] : memref<2x1x1024xf32, #tpu.memory_space<vmem>>, vector<1x1x1024xf32>
    %29 = vector.shape_cast %28 : vector<1x1x1024xf32> to vector<1x1024xf32>
    %30 = math.cos %25 : vector<1x1024xf32>
    %31 = arith.mulf %23, %30 : vector<1x1024xf32>
    %cst_16 = arith.constant 1.000000e-01 : f32
    %32 = vector.broadcast %cst_16 : f32 to vector<1x1024xf32>
    %33 = arith.mulf %32, %31 : vector<1x1024xf32>
    %34 = arith.addf %27, %33 : vector<1x1024xf32>
    %c0_17 = arith.constant 0 : index
    %c0_18 = arith.constant 0 : index
    %c0_19 = arith.constant 0 : index
    %35 = vector.load %arg3[%c0_17, %c0_18, %c0_19] : memref<2x1x1024xf32, #tpu.memory_space<vmem>>, vector<1x1x1024xf32>
    %36 = vector.shape_cast %35 : vector<1x1x1024xf32> to vector<1x1024xf32>
    %37 = vector.shape_cast %34 : vector<1x1024xf32> to vector<1x1x1024xf32>
    tpu.vector_store %arg3[%c0_17, %c0_18, %c0_19], %37 {strides = array<i32>} : memref<2x1x1024xf32, #tpu.memory_space<vmem>>, vector<1x1x1024xf32>,
    %38 = math.sin %25 : vector<1x1024xf32>
    %39 = arith.mulf %23, %38 : vector<1x1024xf32>
    %cst_20 = arith.constant 1.000000e-01 : f32
    %40 = vector.broadcast %cst_20 : f32 to vector<1x1024xf32>
    %41 = arith.mulf %40, %39 : vector<1x1024xf32>
    %42 = arith.addf %29, %41 : vector<1x1024xf32>
    %c1_21 = arith.constant 1 : index
    %c0_22 = arith.constant 0 : index
    %c0_23 = arith.constant 0 : index
    %43 = vector.load %arg3[%c1_21, %c0_22, %c0_23] : memref<2x1x1024xf32, #tpu.memory_space<vmem>>, vector<1x1x1024xf32>
    %44 = vector.shape_cast %43 : vector<1x1x1024xf32> to vector<1x1024xf32>
    %45 = vector.shape_cast %42 : vector<1x1024xf32> to vector<1x1x1024xf32>
    tpu.vector_store %arg3[%c1_21, %c0_22, %c0_23], %45 {strides = array<i32>} : memref<2x1x1024xf32, #tpu.memory_space<vmem>>, vector<1x1x1024xf32>,
    return
  }
  func.func @transform_0(%arg0: i32) -> (i32, i32, i32) {
    %c0_i32 = arith.constant 0 : i32
    %c0_i32_0 = arith.constant 0 : i32
    %c0_i32_1 = arith.constant 0 : i32
    return %c0_i32, %arg0, %c0_i32_0 : i32, i32, i32
  }
  func.func @transform_1(%arg0: i32) -> (i32, i32, i32) {
    %c0_i32 = arith.constant 0 : i32
    %c0_i32_0 = arith.constant 0 : i32
    %c0_i32_1 = arith.constant 0 : i32
    return %c0_i32, %arg0, %c0_i32_0 : i32, i32, i32
  }
  func.func @transform_2(%arg0: i32) -> (i32, i32, i32) {
    %c0_i32 = arith.constant 0 : i32
    %c0_i32_0 = arith.constant 0 : i32
    %c0_i32_1 = arith.constant 0 : i32
    return %c0_i32, %arg0, %c0_i32_0 : i32, i32, i32
  }
}

</mosaic_0001>

<bundles_post_ra>
// kernel: tpu_custom_call.1
= control target key start
LH: loop header
LB: loop body
LE: loop exit
PB: predicated region body
PF: predicated region fallthrough
CT: control target
= control target key end

     0   :  { %7 = vsyncpa [#allocation3], 0  ;;  %s464_s0 = inlined_call_operand.hbm [shape: f32[2,1,1024], index: 0, kind: input, shape index: {}]   ;;  %s465_s1 = inlined_call_operand.hbm [shape: s32[2,1,1024], index: 1, kind: input, shape index: {}]   ;;  %s466_s2 = inlined_call_operand.hbm [shape: f32[2,1,1024], index: 2, kind: output, shape index: {}]  }
   0x1   :  { %8 = vsyncpa [#allocation6], 0 }
   0x2   :  { %9 = vsyncpa [#allocation4], 0  ;;  %s399_s9 = smov [#allocation2]  }
   0x3   :  { %s15_s10 = sshll.u32 %s399_s9, 4  ;;  %s16_s10 = int_to_ptr.vmem [resolvable:$true] %s15_s10 }
   0x4   :  { %s341_s11 = scalar_lea.vmem %s16_s10, 256  ;;  %p346_p1 = scmp.lt.s32.totalorder %s16_s10, %s16_s10 }
   0x5   :  { %p342_p0 = scmp.ne.s32.totalorder %s16_s10, %s341_s11  ;;  %p347_p2 = scmp.lt.s32.totalorder %s341_s11, %s341_s11 }
   0x7   :  { %p348_p3 = por %p347_p2, %p346_p1 }
   0x9   :  { %p349_p4 = pnand %p348_p3, %p342_p0 }
   0xb   :  { %352 = shalt.err (!%p349_p4)
}
   0xc   :  { %s400_s12 = smov 128   ;;  %s401_s13 = smov 8  }
   0xd   :  { %21 = dma.hbm_to_vmem [thread:$0]  %s464_s0, 256, %s16_s10, [#allocation3], %s400_s12, %s400_s12, %s401_s13  }
   0xe   :  { %s402_s16 = smov [#allocation5]  }
   0xf   :  { %s27_s17 = sshll.u32 %s402_s16, 4  ;;  %s28_s17 = int_to_ptr.vmem [resolvable:$true] %s27_s17 }
  0x10   :  { %s361_s18 = scalar_lea.vmem %s28_s17, 256  ;;  %p366_p6 = scmp.lt.s32.totalorder %s28_s17, %s28_s17 }
  0x11   :  { %p362_p5 = scmp.ne.s32.totalorder %s28_s17, %s361_s18  ;;  %p367_p7 = scmp.lt.s32.totalorder %s361_s18, %s361_s18 }
  0x13   :  { %p368_p8 = por %p367_p7, %p366_p6 }
  0x15   :  { %p369_p9 = pnand %p368_p8, %p362_p5 }
  0x17   :  { %372 = shalt.err (!%p369_p9)
}
  0x18   :  { %33 = dma.hbm_to_vmem [thread:$0]  %s465_s1, 256, %s28_s17, [#allocation6], %s400_s12, %s400_s12, %s401_s13  }
  0x19   :  { %393 = dma.done.wait [#allocation3], 256  }
  0x1a   :  { %394 = vsyncadd [#allocation3], 4294967040 }
  0x1b   :  { %395 = dma.done.wait [#allocation6], 256  }
  0x1c   :  { %396 = vsyncadd [#allocation6], 4294967040  ;;  %v44_v0 = vld [vmem:[#allocation5 + $0x8] sm:$0xff]  ;;  %v403_v15 = vmov 683565275   ;;  %v40_v28 = vld [vmem:[#allocation5] sm:$0xff] }
  0x1d   :  { %v301_v1 = vshrl.u32 %v44_v0, 8  ;;  %v404_v17 = vmov 2475754826   ;;  %v405_v19 = vmov 2131351028   ;;  %v300_v39 = vshrl.u32 %v40_v28, 8 }
  0x1e   :  { %v406_v21 = vmov 2102212464   ;;  %v407_v23 = vmov 920167782   ;;  %v408_v32 = vmov 1326507024  }
  0x1f   :  { %v50_v2 = vcvt.s32.f32 %v301_v1  ;;  %v47_v55 = vcvt.s32.f32 %v300_v39  ;;  %s409_s0 = smov [#allocation7]  }
  0x20   :  { %s287_s1 = sshll.u32 %s409_s0, 4  ;;  %s288_s1 = int_to_ptr.vmem [resolvable:$true] %s287_s1 }
  0x21   :  { %v51_v3 = vmul.f32 5.9604645e-08, %v50_v2  ;;  %v48_v60 = vadd.f32 0.5, %v47_v55  ;;  %s373_s21 = scalar_lea.vmem %s288_s1, 256  ;;  %p378_p11 = scmp.lt.s32.totalorder %s288_s1, %s288_s1 }
  0x22   :  { %p374_p10 = scmp.ne.s32.totalorder %s288_s1, %s373_s21  ;;  %p379_p12 = scmp.lt.s32.totalorder %s373_s21, %s373_s21 }
  0x23   :  { %v437_v4 = vmul.f32 6.2831855, %v51_v3  ;;  %v49_v63 = vmul.f32 5.9604645e-08, %v48_v60 }
  0x24   :  { %p380_p13 = por %p379_p12, %p378_p11 }
  0x25   :  { %v69_v5 = vand.u32 2139095040, %v437_v4  ;;  %v66_v8 = vand.u32 2147483647, %v437_v4  ;;  %325 = vlog2.f32 %v49_v63  ;;  %vm68_vm7 = vcmp.lt.s32.totalorder %v437_v4, 0 }
  0x26   :  { %p381_p0 = pnand %p380_p13, %p374_p10 }
  0x27   :  { %v70_v6 = vshrl.u32 %v69_v5, 23  ;;  %v73_v11 = vand.u32 8388607, %v66_v8  ;;  %vm67_vm8 = vcmp.le.f32.partialorder %v66_v8, 0.7853982 }
  0x29   :  { %v302_v7 = vadd.s32 4294967169, %v70_v6  ;;  %v74_v25 = vor.u32 8388608, %v73_v11 }
  0x2b   :  { %v76_v9 = vadd.s32 1, %v302_v7  ;;  %v114_v40 = vshll.u32 %v74_v25, 8 }
  0x2d   :  { %vm77_vm0 = vcmp.gt.s32.totalorder %v76_v9, 0 }
  0x2e   :  { %v78_v10 = vsel %vm77_vm0, %v76_v9, 0 }
  0x2f   :  { %v80_v12 = vand.u32 31, %v78_v10  ;;  %v79_v13 = vshrl.u32 %v78_v10, 5 }
  0x31   :  { %v81_v14 = vsub.s32 32, %v80_v12  ;;  %v83_v16 = vshll.u32 %v403_v15, %v80_v12  ;;  %v86_v18 = vshll.u32 %v404_v17, %v80_v12  ;;  %v89_v20 = vshll.u32 %v405_v19, %v80_v12 }
  0x32   :  { %v92_v22 = vshll.u32 %v406_v21, %v80_v12  ;;  %v95_v24 = vshll.u32 %v407_v23, %v80_v12  ;;  %vm98_vm1 = vcmp.lt.s32.totalorder %v79_v13, 1  ;;  %vm101_vm2 = vcmp.lt.s32.totalorder %v79_v13, 4  ;;  %v326_v11 = vpop.eup %325 }
  0x33   :  { %v84_v26 = vshrl.u32 %v404_v17, %v81_v14  ;;  %v87_v27 = vshrl.u32 %v405_v19, %v81_v14  ;;  %v82_v29 = vshrl.u32 %v403_v15, %v81_v14  ;;  %v90_v30 = vshrl.u32 %v406_v21, %v81_v14 }
  0x34   :  { %v93_v31 = vshrl.u32 %v407_v23, %v81_v14  ;;  %v96_v33 = vshrl.u32 %v408_v32, %v81_v14  ;;  %vm100_vm3 = vcmp.lt.s32.totalorder %v79_v13, 3  ;;  %vm99_vm4 = vcmp.lt.s32.totalorder %v79_v13, 2 }
  0x35   :  { %v85_v34 = vor.u32 %v84_v26, %v83_v16  ;;  %v88_v35 = vor.u32 %v87_v27, %v86_v18  ;;  %v91_v36 = vor.u32 %v90_v30, %v89_v20  ;;  %v53_v16 = vmul.f32 0.6931472, %v326_v11 }
  0x36   :  { %v94_v37 = vor.u32 %v93_v31, %v92_v22  ;;  %v97_v38 = vor.u32 %v96_v33, %v95_v24 }
  0x37   :  { %v102_v41 = vsel %vm98_vm1, %v82_v29, %v85_v34  ;;  %v103_v42 = vsel %vm101_vm2, %v91_v36, 2102212464  ;;  %v106_v43 = vsel %vm98_vm1, %v85_v34, %v88_v35  ;;  %v110_v47 = vsel %vm98_vm1, %v88_v35, %v91_v36 }
  0x38   :  { %v107_v44 = vsel %vm101_vm2, %v94_v37, 920167782  ;;  %v104_v45 = vsel %vm100_vm3, %v88_v35, %v103_v42  ;;  %v111_v48 = vsel %vm101_vm2, %v97_v38, 1326507024  ;;  %v54_v21 = vmul.f32 -2.0, %v53_v16 }
  0x39   :  { %v108_v46 = vsel %vm100_vm3, %v91_v36, %v107_v44  ;;  %v112_v50 = vsel %vm100_vm3, %v94_v37, %v111_v48  ;;  %v105_v51 = vsel %vm99_vm4, %v102_v41, %v104_v45  ;;  %vm158_vm1 = vweird.f32 %v437_v4 }
  0x3a   :  { %v109_v49 = vsel %vm99_vm4, %v106_v43, %v108_v46  ;;  %v113_v52 = vsel %vm99_vm4, %v110_v47, %v112_v50  ;;  %v121_v58 = vmul.u32 %v114_v40, %v105_v51  ;;  %327 = vrsqrt.f32 %v54_v21 }
  0x3b   :  { %v443_v53 = vmul.u32.u64.low %v114_v40, %v109_v49  ;;  %v444_v54 = vmul.u32.u64.high %v114_v40, %v109_v49, %v443_v53  ;;  %v446_v56 = vmul.u32.u64.low %v114_v40, %v113_v52  ;;  %v447_v57 = vmul.u32.u64.high %v114_v40, %v113_v52, %v446_v56 }
  0x3c   :  { %vm57_vm9 = vcmp.eq.f32.partialorder %v54_v21, inf  ;;  %vm59_vm10 = vcmp.eq.f32.partialorder %v54_v21, 0.0  ;;  %v60_v38 = vand.u32 2147483648, %v54_v21 }
  0x3d   :  { %v124_v59 = vadd.s32 1, %v444_v54  ;;  %vm123_vm5 = vc.u32 %v447_v57, %v443_v53  ;;  %v122_v10 = vadd.s32 %v443_v53, %v447_v57  ;;  %v63_v53 = vld [vmem:[#allocation2] sm:$0xff] }
  0x3f   :  { %v125_v61 = vsel %vm123_vm5, %v124_v59, %v444_v54  ;;  %v65_v54 = vld [vmem:[#allocation2 + $0x8] sm:$0xff] }
  0x40   :  { %v126_v62 = vadd.s32 %v125_v61, %v121_v58 }
  0x42   :  { %v127_v0 = vadd.s32 536870912, %v126_v62 }
  0x44   :  { %v128_v1 = vshrl.u32 %v127_v0, 30 }
  0x46   :  { %v129_v2 = vshll.u32 %v128_v1, 30  ;;  %v152_v26 = vsub.s32 4, %v128_v1 }
  0x47   :  { %v328_v33 = vpop.eup %327 }
  0x48   :  { %v130_v3 = vsub.s32 %v126_v62, %v129_v2  ;;  %v153_v29 = vsel %vm68_vm7, %v152_v26, %v128_v1  ;;  %v56_v36 = vmul.f32 %v328_v33, %v54_v21 }
  0x49   :  { %v155_v31 = vsel %vm67_vm8, 0, %v153_v29 }
  0x4a   :  { %v132_v5 = vsub.s32 0, %v130_v3  ;;  %v266_v32 = vadd.s32 3, %v155_v31  ;;  %v159_v34 = vand.u32 3, %v155_v31  ;;  %v58_v39 = vsel %vm57_vm9, %v54_v21, %v56_v36 }
  0x4b   :  { %v61_v44 = vsel %vm59_vm10, %v60_v38, %v58_v39 }
  0x4c   :  { %v303_v6 = vmin.u32 %v132_v5, %v130_v3  ;;  %v267_v35 = vand.u32 3, %v266_v32  ;;  %vm164_vm11 = vcmp.eq.s32.totalorder %v159_v34, 2  ;;  %vm161_vm13 = vcmp.eq.s32.totalorder %v159_v34, 0 }
  0x4d   :  { %vm160_vm15 = vcmp.lt.s32.totalorder %v159_v34, 2 }
  0x4e   :  { %v134_v7 = vclz %v303_v6  ;;  %vm272_vm12 = vcmp.eq.s32.totalorder %v267_v35, 2  ;;  %vm269_vm14 = vcmp.eq.s32.totalorder %v267_v35, 0  ;;  %vm268_vm0 = vcmp.lt.s32.totalorder %v267_v35, 2 }
  0x50   :  { %v304_v9 = vadd.s32 4294967294, %v134_v7 }
  0x52   :  { %vm305_vm6 = vcmp.lt.s32.totalorder %v304_v9, 0 }
  0x53   :  { %v137_v12 = vsel %vm305_vm6, 0, %v304_v9 }
  0x54   :  { %v138_v13 = vsub.s32 32, %v137_v12  ;;  %v139_v14 = vshll.u32 %v130_v3, %v137_v12  ;;  %v142_v15 = vsub.s32 4294967266, %v137_v12 }
  0x56   :  { %v140_v17 = vshrl.u32 %v122_v10, %v138_v13  ;;  %v143_v18 = vadd.s32 127, %v142_v15 }
  0x58   :  { %v141_v19 = vor.u32 %v140_v17, %v139_v14  ;;  %v144_v20 = vshll.u32 %v143_v18, 23 }
  0x5a   :  { %v145_v22 = vor.u32 4788187, %v144_v20  ;;  %v148_v23 = vcvt.s32.f32 %v141_v19 }
  0x5c   :  { %v146_v24 = vand.u32 2147483647, %v145_v22 }
  0x5e   :  { %v149_v25 = vmul.f32 %v148_v23, %v146_v24 }
  0x60   :  { %v150_v27 = vxor.u32 2147483648, %v149_v25 }
  0x62   :  { %v151_v28 = vsel %vm68_vm7, %v150_v27, %v149_v25 }
  0x63   :  { %v154_v30 = vsel %vm67_vm8, %v437_v4, %v151_v28 }
  0x64   :  { %329 = vcosq.f32 %v154_v30 }
  0x65   :  { %331 = vsinq.f32 %v154_v30 }
  0x71   :  { %v330_v37 = vpop.eup %329 }
  0x72   :  { %v332_v8 = vpop.eup %331  ;;  %v165_v40 = vxor.u32 2147483648, %v330_v37 }
  0x73   :  { %v162_v41 = vxor.u32 2147483648, %v332_v8 }
  0x74   :  { %v166_v42 = vsel %vm164_vm11, %v165_v40, %v332_v8  ;;  %v274_v43 = vsel %vm272_vm12, %v165_v40, %v332_v8 }
  0x75   :  { %v163_v45 = vsel %vm161_vm13, %v330_v37, %v162_v41  ;;  %v271_v46 = vsel %vm269_vm14, %v330_v37, %v162_v41 }
  0x76   :  { %v167_v47 = vsel %vm160_vm15, %v163_v45, %v166_v42  ;;  %v275_v48 = vsel %vm268_vm0, %v271_v46, %v274_v43 }
  0x77   :  { %v168_v49 = vsel %vm158_vm1, nan, %v167_v47  ;;  %v276_v50 = vsel %vm158_vm1, nan, %v275_v48 }
  0x78   :  { %v169_v51 = vmul.f32 %v168_v49, %v61_v44  ;;  %v277_v52 = vmul.f32 %v276_v50, %v61_v44 }
  0x7a   :  { %v170_v55 = vmul.f32 0.1, %v169_v51  ;;  %v278_v56 = vmul.f32 0.1, %v277_v52 }
  0x7c   :  { %v171_v57 = vadd.f32 %v170_v55, %v63_v53  ;;  %v279_v58 = vadd.f32 %v278_v56, %v65_v54 }
  0x7e   :  { %172 = vst [vmem:[#allocation7] sm:$0xff] %v171_v57  ;;  %281 = vst [vmem:[#allocation7 + $0x8] sm:$0xff] %v279_v58 }
  0x7f   :  { %384 = shalt.err (!%p381_p0)
}
  0x80   :  { %293 = dma.vmem_to_hbm [thread:$0]  %s288_s1, 256, %s466_s2, [#allocation4], %s400_s12, %s400_s12, %s401_s13  }
  0x81   :  { %397 = dma.done.wait [#allocation4], 256  }
  0x82   :  { %398 = vsyncadd [#allocation4], 4294967040 }
  0x83   :  { %297 = vsyncpa [#allocation3], 1 }
  0x84   :  { %298 = vsyncpa [#allocation6], 1 }
  0x85   :  { %299 = vsyncpa [#allocation4], 1 }

</bundles_post_ra>
